<compile_context>
chip_gen: v5e
topology: v5e:2x2
jax: 0.10.0
libtpu: 0.0.40
codegen_flags: <defaults>
</compile_context>

<pallas_src>
import functools

import jax
import jax.numpy as jnp
from jax.experimental import pallas as pl
from jax.experimental.pallas import tpu as pltpu


# ------------------------------------------------------------- fused path ---
def _fused_kernel(feat_ref, w1_ref, b1_ref, w2_ref, b2_ref, out_ref, *,
                  inv_l, bt):
    """Single-pass SE for one (bt, C, L) batch group (read once, write once)."""
    for b in range(bt):                                   # bt is small & static
        x = feat_ref[b]                                   # (C, L), feat dtype
        # f32-accumulated GAP without materializing an f32 copy of the tile.
        gap = jnp.sum(x, axis=-1, keepdims=True,
                      dtype=jnp.float32) * jnp.float32(inv_l)        # (C, 1)
        h = jnp.dot(w1_ref[...], gap,
                    preferred_element_type=jnp.float32) + b1_ref[...]  # (Cr,1)
        h = jnp.maximum(h, 0.0)
        s = jnp.dot(w2_ref[...], h,
                    preferred_element_type=jnp.float32) + b2_ref[...]  # (C, 1)
        gate = jax.nn.sigmoid(s).astype(x.dtype)          # (C, 1) column gate
        out_ref[b] = (x * gate).astype(out_ref.dtype)     # lane-broadcast mul


# --------------------------------------------------------- tiled fallback ---
def _gap_kernel(feat_ref, pooled_ref, *, inv_l):
    """Tiled GAP: f32-accumulated spatial sums; mean on the last L tile."""
    l = pl.program_id(2)

    @pl.when(l == 0)
    def _():
        pooled_ref[...] = jnp.zeros_like(pooled_ref)

    pooled_ref[0] += jnp.sum(feat_ref[0], axis=-1, keepdims=True,
                             dtype=jnp.float32)           # (tc, 1) column

    @pl.when(l == pl.num_programs(2) - 1)
    def _():
        pooled_ref[...] = pooled_ref[...] * jnp.float32(inv_l)


def _scale_kernel(feat_ref, gate_ref, out_ref):
    """Streaming multiply: (tc, tl) lane-dense tile * resident (tc, 1) gate."""
    out_ref[0] = (feat_ref[0] * gate_ref[0]).astype(out_ref.dtype)


# ----------------------------------------------------------------- sizing ---
def _vmem_capacity_bytes():
    """Generation-aware VMEM capacity (64 MiB/TC v7x, 128 MiB v5e/v6e)."""
    try:
        return int(pltpu.get_tpu_info().vmem_capacity_bytes)
    except Exception:
        return 64 << 20                     # conservative: v7x per-TC VMEM


def _pick_batch_fold(B, slab_bytes, budget, max_fold=8):
    """Smallest divisor of B reaching ~2 MiB/step, bounded by the VMEM budget.

    Returns None if even a single batch element's slab does not fit.
    """
    divs = [d for d in range(1, B + 1) if B % d == 0 and d <= max_fold]
    fits = [d for d in divs if 4 * d * slab_bytes <= budget]
    if not fits:
        return None
    target = 2 << 20                        # ~2 MiB payload per grid step
    for d in fits:
        if d * slab_bytes >= target:
            return d
    return fits[-1]                         # largest that fits (< target)


def _choose_tiles(C, L, itemsize, per_tile_budget):
    """(tc, tl): lane-dense spatial tile, sublane-aligned channel tile."""
    l_opts = [L] + [t for t in (16384, 8192, 4096, 2048, 1024, 512, 256, 128)
                    if t < L and L % t == 0]
    c_opts = [C] + [t for t in (4096, 2048, 1024, 512, 256, 128, 64, 32, 16, 8)
                    if t < C and C % t == 0]
    for tc in c_opts:                       # prefer full-C blocks, then tile C
        for tl in l_opts:                   # largest lane-dense spatial tile
            if tc * tl * itemsize <= per_tile_budget:
                return tc, tl
    return c_opts[-1], l_opts[-1]           # last resort: smallest legal tiles


# ---------------------------------------------------------------- wrapper ---
def ca_module(feat, w1, b1, w2, b2, *, vmem_budget_bytes=None):
    """feat: (B, C, L); w1: (C//r, C); b1: (C//r,); w2: (C, C//r); b2: (C,)."""
    B, C, L = feat.shape
    Cr = w1.shape[0]
    itemsize = feat.dtype.itemsize

    cap = _vmem_capacity_bytes()
    budget = int(cap * 0.4) if vmem_budget_bytes is None else int(vmem_budget_bytes)
    vmem_limit = int(cap * 0.85)            # raise scoped limit explicitly

    # Excite parameters in f32, shaped for the column-orientation matvecs.
    w1f = jnp.asarray(w1, jnp.float32)                    # (Cr, C)
    w2f = jnp.asarray(w2, jnp.float32)                    # (C, Cr)
    b1c = jnp.asarray(b1, jnp.float32).reshape(Cr, 1)
    b2c = jnp.asarray(b2, jnp.float32).reshape(C, 1)

    # --- fused single-pass path: ~2x B*C*L HBM bytes, one dispatch ----------
    slab_bytes = C * L * itemsize
    bt = _pick_batch_fold(B, slab_bytes, budget)
    if bt is not None:
        return pl.pallas_call(
            functools.partial(_fused_kernel, inv_l=1.0 / L, bt=bt),
            out_shape=jax.ShapeDtypeStruct((B, C, L), feat.dtype),
            grid_spec=pltpu.PrefetchScalarGridSpec(
                num_scalar_prefetch=0,
                grid=(B // bt,),
                in_specs=[
                    pl.BlockSpec((bt, C, L), lambda b: (b, 0, 0)),
                    pl.BlockSpec((Cr, C), lambda b: (0, 0)),   # tiny, resident
                    pl.BlockSpec((Cr, 1), lambda b: (0, 0)),
                    pl.BlockSpec((C, Cr), lambda b: (0, 0)),
                    pl.BlockSpec((C, 1), lambda b: (0, 0)),
                ],
                out_specs=pl.BlockSpec((bt, C, L), lambda b: (b, 0, 0)),
            ),
            compiler_params=pltpu.CompilerParams(
                dimension_semantics=("parallel",),
                vmem_limit_bytes=vmem_limit),
        )(feat, w1f, b1c, w2f, b2c)

    # --- tiled fallback (a single (1, C, L) slab exceeds the budget) --------
    tc, tl = _choose_tiles(C, L, itemsize, budget // 4)
    n_c, n_l = C // tc, L // tl

    # Pass 1: squeeze (tiled GAP reduction, f32, reduction axis last).
    pooled = pl.pallas_call(
        functools.partial(_gap_kernel, inv_l=1.0 / L),
        out_shape=jax.ShapeDtypeStruct((B, C, 1), jnp.float32),
        grid_spec=pltpu.PrefetchScalarGridSpec(
            num_scalar_prefetch=0,
            grid=(B, n_c, n_l),
            in_specs=[pl.BlockSpec((1, tc, tl), lambda b, c, l: (b, c, l))],
            out_specs=pl.BlockSpec((1, tc, 1), lambda b, c, l: (b, c, 0)),
        ),
        compiler_params=pltpu.CompilerParams(
            dimension_semantics=("parallel", "parallel", "arbitrary"),
            vmem_limit_bytes=vmem_limit),
    )(feat)

    # Pass 2: tiny excite in plain XLA (off the streaming path, ~B*C work,
    # no extra custom-call dispatch).
    gap = pooled[:, :, 0]                                 # (B, C) f32
    h = jnp.maximum(gap @ w1f.T + b1c[:, 0], 0.0)         # (B, Cr)
    gate = jax.nn.sigmoid(h @ w2f.T + b2c[:, 0])          # (B, C)
    gate_col = gate[:, :, None].astype(feat.dtype)        # (B, C, 1)

    # Pass 3: streaming scale, lane-dense tiles, fully parallel grid.
    return pl.pallas_call(
        _scale_kernel,
        out_shape=jax.ShapeDtypeStruct((B, C, L), feat.dtype),
        grid_spec=pltpu.PrefetchScalarGridSpec(
            num_scalar_prefetch=0,
            grid=(B, n_c, n_l),
            in_specs=[
                pl.BlockSpec((1, tc, tl), lambda b, c, l: (b, c, l)),
                pl.BlockSpec((1, tc, 1), lambda b, c, l: (b, c, 0)),  # resident
            ],
            out_specs=pl.BlockSpec((1, tc, tl), lambda b, c, l: (b, c, l)),
        ),
        compiler_params=pltpu.CompilerParams(
            dimension_semantics=("parallel", "parallel", "parallel"),
            vmem_limit_bytes=vmem_limit),
    )(feat, gate_col)


def ca_module_ref(feat, w1, b1, w2, b2):
    """Pure-JAX reference mirroring the PyTorch forward."""
    gap = feat.astype(jnp.float32).mean(axis=2)           # (B, C)
    h = jnp.maximum(gap @ w1.T + b1, 0.0)                 # (B, C//r)
    s = jax.nn.sigmoid(h @ w2.T + b2)                     # (B, C)
    return (feat * s[:, :, None].astype(feat.dtype)).astype(feat.dtype)


if __name__ == "__main__":
    B, C, reduc = 2, 16, 2
    H = W = 32
    L = H * W                              # 1024 flattened spatial positions
    Cr = C // reduc

    key = jax.random.PRNGKey(0)
    k_feat, k_w1, k_b1, k_w2, k_b2 = jax.random.split(key, 5)

    feat = jax.random.normal(k_feat, (B, C, L), jnp.float32)

    # Deterministic parameter init (nn.Linear-style uniform bounds).
    bound1 = 1.0 / jnp.sqrt(C)
    w1 = jax.random.uniform(k_w1, (Cr, C), jnp.float32, -bound1, bound1)
    b1 = jax.random.uniform(k_b1, (Cr,), jnp.float32, -bound1, bound1)
    bound2 = 1.0 / jnp.sqrt(Cr)
    w2 = jax.random.uniform(k_w2, (C, Cr), jnp.float32, -bound2, bound2)
    b2 = jax.random.uniform(k_b2, (C,), jnp.float32, -bound2, bound2)

    ref = jax.block_until_ready(ca_module_ref(feat, w1, b1, w2, b2))

    # 1) Fused single-pass path (taken for all realistic SE shapes).
    out = jax.block_until_ready(ca_module(feat, w1, b1, w2, b2))
    assert out.shape == (B, C, L)
    assert out.dtype == feat.dtype
    assert jnp.allclose(out, ref, atol=1e-5, rtol=1e-5)

    # 2) Tiled fallback path, forced by an artificially tiny VMEM budget
    #    (exercises the C/L-tiled squeeze + plain-jnp excite + scale path).
    out_fb = jax.block_until_ready(
        ca_module(feat, w1, b1, w2, b2, vmem_budget_bytes=128 * 1024))
    assert jnp.allclose(out_fb, ref, atol=1e-5, rtol=1e-5)

    print("KERNEL_OK")
</pallas_src>

<mosaic_0001>
module attributes {stable_mosaic.version = 11 : i64} {
  func.func @_fused_kernel(%arg0: i32, %arg1: memref<2x16x1024xf32, #tpu.memory_space<vmem>>, %arg2: memref<8x16xf32, #tpu.memory_space<vmem>>, %arg3: memref<8x1xf32, #tpu.memory_space<vmem>>, %arg4: memref<16x8xf32, #tpu.memory_space<vmem>>, %arg5: memref<16x1xf32, #tpu.memory_space<vmem>>, %arg6: memref<2x16x1024xf32, #tpu.memory_space<vmem>>) attributes {dimension_semantics = [#tpu.dimension_semantics<parallel>], iteration_bounds = array<i64: 1>, scalar_prefetch = 0 : i64, scratch_operands = 0 : i64, tpu.core_type = #tpu.core_type<tc>, window_params = [{transform_indices = @transform_0, window_bounds = array<i64: 2, 16, 1024>}, {pipeline_mode = #tpu.pipeline_mode<synchronous>, transform_indices = @transform_1, window_bounds = array<i64: 8, 16>}, {pipeline_mode = #tpu.pipeline_mode<synchronous>, transform_indices = @transform_2, window_bounds = array<i64: 8, 1>}, {pipeline_mode = #tpu.pipeline_mode<synchronous>, transform_indices = @transform_3, window_bounds = array<i64: 16, 8>}, {pipeline_mode = #tpu.pipeline_mode<synchronous>, transform_indices = @transform_4, window_bounds = array<i64: 16, 1>}, {transform_indices = @transform_5, window_bounds = array<i64: 2, 16, 1024>}]} {
    %c0 = arith.constant 0 : index
    %c0_0 = arith.constant 0 : index
    %c0_1 = arith.constant 0 : index
    %0 = vector.load %arg1[%c0, %c0_0, %c0_1] : memref<2x16x1024xf32, #tpu.memory_space<vmem>>, vector<1x16x1024xf32>
    %1 = vector.shape_cast %0 : vector<1x16x1024xf32> to vector<16x1024xf32>
    %cst = arith.constant dense<0.000000e+00> : vector<16xf32>
    %2 = vector.multi_reduction <add>, %1, %cst [1] : vector<16x1024xf32> to vector<16xf32>
    %3 = vector.shape_cast %2 : vector<16xf32> to vector<16x1xf32>
    %cst_2 = arith.constant 9.765625E-4 : f32
    %4 = vector.broadcast %cst_2 : f32 to vector<16x1xf32>
    %5 = arith.mulf %3, %4 : vector<16x1xf32>
    %c0_3 = arith.constant 0 : index
    %c0_4 = arith.constant 0 : index
    %6 = vector.load %arg2[%c0_3, %c0_4] : memref<8x16xf32, #tpu.memory_space<vmem>>, vector<8x16xf32>
    %cst_5 = arith.constant dense<0.000000e+00> : vector<8x1xf32>
    %7 = tpu.matmul %6, %5, %cst_5 {dimension_numbers = #tpu.dot_dimension_numbers<[1], [0], [0], [1], [0, 0, 1, 1], [], []>} : vector<8x16xf32>, vector<16x1xf32>, vector<8x1xf32> -> vector<8x1xf32>
    %c0_6 = arith.constant 0 : index
    %c0_7 = arith.constant 0 : index
    %8 = vector.load %arg3[%c0_6, %c0_7] : memref<8x1xf32, #tpu.memory_space<vmem>>, vector<8x1xf32>
    %9 = arith.addf %7, %8 : vector<8x1xf32>
    %cst_8 = arith.constant 0.000000e+00 : f32
    %10 = vector.broadcast %cst_8 : f32 to vector<8x1xf32>
    %11 = arith.maximumf %9, %10 : vector<8x1xf32>
    %c0_9 = arith.constant 0 : index
    %c0_10 = arith.constant 0 : index
    %12 = vector.load %arg4[%c0_9, %c0_10] : memref<16x8xf32, #tpu.memory_space<vmem>>, vector<16x8xf32>
    %cst_11 = arith.constant dense<0.000000e+00> : vector<16x1xf32>
    %13 = tpu.matmul %12, %11, %cst_11 {dimension_numbers = #tpu.dot_dimension_numbers<[1], [0], [0], [1], [0, 0, 1, 1], [], []>} : vector<16x8xf32>, vector<8x1xf32>, vector<16x1xf32> -> vector<16x1xf32>
    %c0_12 = arith.constant 0 : index
    %c0_13 = arith.constant 0 : index
    %14 = vector.load %arg5[%c0_12, %c0_13] : memref<16x1xf32, #tpu.memory_space<vmem>>, vector<16x1xf32>
    %15 = arith.addf %13, %14 : vector<16x1xf32>
    %16 = arith.negf %15 : vector<16x1xf32>
    %17 = math.exp %16 : vector<16x1xf32>
    %cst_14 = arith.constant 1.000000e+00 : f32
    %18 = vector.broadcast %cst_14 : f32 to vector<16x1xf32>
    %19 = arith.addf %18, %17 : vector<16x1xf32>
    %20 = arith.divf %18, %19 : vector<16x1xf32>
    %21 = vector.broadcast %20 : vector<16x1xf32> to vector<16x1024xf32>
    %22 = arith.mulf %1, %21 : vector<16x1024xf32>
    %c0_15 = arith.constant 0 : index
    %c0_16 = arith.constant 0 : index
    %c0_17 = arith.constant 0 : index
    %23 = vector.load %arg6[%c0_15, %c0_16, %c0_17] : memref<2x16x1024xf32, #tpu.memory_space<vmem>>, vector<1x16x1024xf32>
    %24 = vector.shape_cast %23 : vector<1x16x1024xf32> to vector<16x1024xf32>
    %25 = vector.shape_cast %22 : vector<16x1024xf32> to vector<1x16x1024xf32>
    tpu.vector_store %arg6[%c0_15, %c0_16, %c0_17], %25 {strides = array<i32>} : memref<2x16x1024xf32, #tpu.memory_space<vmem>>, vector<1x16x1024xf32>,
    %c1 = arith.constant 1 : index
    %c0_18 = arith.constant 0 : index
    %c0_19 = arith.constant 0 : index
    %26 = vector.load %arg1[%c1, %c0_18, %c0_19] : memref<2x16x1024xf32, #tpu.memory_space<vmem>>, vector<1x16x1024xf32>
    %27 = vector.shape_cast %26 : vector<1x16x1024xf32> to vector<16x1024xf32>
    %cst_20 = arith.constant dense<0.000000e+00> : vector<16xf32>
    %28 = vector.multi_reduction <add>, %27, %cst_20 [1] : vector<16x1024xf32> to vector<16xf32>
    %29 = vector.shape_cast %28 : vector<16xf32> to vector<16x1xf32>
    %cst_21 = arith.constant 9.765625E-4 : f32
    %30 = vector.broadcast %cst_21 : f32 to vector<16x1xf32>
    %31 = arith.mulf %29, %30 : vector<16x1xf32>
    %c0_22 = arith.constant 0 : index
    %c0_23 = arith.constant 0 : index
    %32 = vector.load %arg2[%c0_22, %c0_23] : memref<8x16xf32, #tpu.memory_space<vmem>>, vector<8x16xf32>
    %cst_24 = arith.constant dense<0.000000e+00> : vector<8x1xf32>
    %33 = tpu.matmul %32, %31, %cst_24 {dimension_numbers = #tpu.dot_dimension_numbers<[1], [0], [0], [1], [0, 0, 1, 1], [], []>} : vector<8x16xf32>, vector<16x1xf32>, vector<8x1xf32> -> vector<8x1xf32>
    %c0_25 = arith.constant 0 : index
    %c0_26 = arith.constant 0 : index
    %34 = vector.load %arg3[%c0_25, %c0_26] : memref<8x1xf32, #tpu.memory_space<vmem>>, vector<8x1xf32>
    %35 = arith.addf %33, %34 : vector<8x1xf32>
    %cst_27 = arith.constant 0.000000e+00 : f32
    %36 = vector.broadcast %cst_27 : f32 to vector<8x1xf32>
    %37 = arith.maximumf %35, %36 : vector<8x1xf32>
    %c0_28 = arith.constant 0 : index
    %c0_29 = arith.constant 0 : index
    %38 = vector.load %arg4[%c0_28, %c0_29] : memref<16x8xf32, #tpu.memory_space<vmem>>, vector<16x8xf32>
    %cst_30 = arith.constant dense<0.000000e+00> : vector<16x1xf32>
    %39 = tpu.matmul %38, %37, %cst_30 {dimension_numbers = #tpu.dot_dimension_numbers<[1], [0], [0], [1], [0, 0, 1, 1], [], []>} : vector<16x8xf32>, vector<8x1xf32>, vector<16x1xf32> -> vector<16x1xf32>
    %c0_31 = arith.constant 0 : index
    %c0_32 = arith.constant 0 : index
    %40 = vector.load %arg5[%c0_31, %c0_32] : memref<16x1xf32, #tpu.memory_space<vmem>>, vector<16x1xf32>
    %41 = arith.addf %39, %40 : vector<16x1xf32>
    %42 = arith.negf %41 : vector<16x1xf32>
    %43 = math.exp %42 : vector<16x1xf32>
    %cst_33 = arith.constant 1.000000e+00 : f32
    %44 = vector.broadcast %cst_33 : f32 to vector<16x1xf32>
    %45 = arith.addf %44, %43 : vector<16x1xf32>
    %46 = arith.divf %44, %45 : vector<16x1xf32>
    %47 = vector.broadcast %46 : vector<16x1xf32> to vector<16x1024xf32>
    %48 = arith.mulf %27, %47 : vector<16x1024xf32>
    %c1_34 = arith.constant 1 : index
    %c0_35 = arith.constant 0 : index
    %c0_36 = arith.constant 0 : index
    %49 = vector.load %arg6[%c1_34, %c0_35, %c0_36] : memref<2x16x1024xf32, #tpu.memory_space<vmem>>, vector<1x16x1024xf32>
    %50 = vector.shape_cast %49 : vector<1x16x1024xf32> to vector<16x1024xf32>
    %51 = vector.shape_cast %48 : vector<16x1024xf32> to vector<1x16x1024xf32>
    tpu.vector_store %arg6[%c1_34, %c0_35, %c0_36], %51 {strides = array<i32>} : memref<2x16x1024xf32, #tpu.memory_space<vmem>>, vector<1x16x1024xf32>,
    return
  }
  func.func @transform_0(%arg0: i32) -> (i32, i32, i32) {
    %c0_i32 = arith.constant 0 : i32
    %c0_i32_0 = arith.constant 0 : i32
    %c0_i32_1 = arith.constant 0 : i32
    return %arg0, %c0_i32, %c0_i32_0 : i32, i32, i32
  }
  func.func @transform_1(%arg0: i32) -> (i32, i32) {
    %c0_i32 = arith.constant 0 : i32
    %c0_i32_0 = arith.constant 0 : i32
    %c0_i32_1 = arith.constant 0 : i32
    return %c0_i32, %c0_i32_0 : i32, i32
  }
  func.func @transform_2(%arg0: i32) -> (i32, i32) {
    %c0_i32 = arith.constant 0 : i32
    %c0_i32_0 = arith.constant 0 : i32
    %c0_i32_1 = arith.constant 0 : i32
    return %c0_i32, %c0_i32_0 : i32, i32
  }
  func.func @transform_3(%arg0: i32) -> (i32, i32) {
    %c0_i32 = arith.constant 0 : i32
    %c0_i32_0 = arith.constant 0 : i32
    %c0_i32_1 = arith.constant 0 : i32
    return %c0_i32, %c0_i32_0 : i32, i32
  }
  func.func @transform_4(%arg0: i32) -> (i32, i32) {
    %c0_i32 = arith.constant 0 : i32
    %c0_i32_0 = arith.constant 0 : i32
    %c0_i32_1 = arith.constant 0 : i32
    return %c0_i32, %c0_i32_0 : i32, i32
  }
  func.func @transform_5(%arg0: i32) -> (i32, i32, i32) {
    %c0_i32 = arith.constant 0 : i32
    %c0_i32_0 = arith.constant 0 : i32
    %c0_i32_1 = arith.constant 0 : i32
    return %arg0, %c0_i32, %c0_i32_0 : i32, i32, i32
  }
}

</mosaic_0001>

<bundles_post_ra>
// kernel: tpu_custom_call.1
= control target key start
LH: loop header
LB: loop body
LE: loop exit
PB: predicated region body
PF: predicated region fallthrough
CT: control target
= control target key end

     0   :  { %10 = vsyncpa [#allocation3], 0  ;;  %s689_s0 = inlined_call_operand.hbm [shape: f32[2,16,1024], index: 0, kind: input, shape index: {}]   ;;  %s690_s1 = inlined_call_operand.vmem [shape: f32[8,16], index: 1, kind: input, shape index: {}]   ;;  %s691_s2 = inlined_call_operand.vmem [shape: f32[8,1], index: 2, kind: input, shape index: {}]   ;;  %s692_s3 = inlined_call_operand.vmem [shape: f32[16,8], index: 3, kind: input, shape index: {}]   ;;  %s693_s4 = inlined_call_operand.vmem [shape: f32[16,1], index: 4, kind: input, shape index: {}]   ;;  %s694_s5 = inlined_call_operand.hbm [shape: f32[2,16,1024], index: 5, kind: output, shape index: {}]  }
   0x1   :  { %11 = vsyncpa [#allocation4], 0  ;;  %s16_s20 = sshll.u32 %s689_s0, 4  ;;  %s496_s21 = smov [#allocation2]   ;;  %s17_s20 = int_to_ptr.hbm [resolvable:$true] %s16_s20 }
   0x2   :  { %s18_s22 = sshll.u32 %s496_s21, 4  ;;  %s497_s23 = smov 1024   ;;  %s19_s22 = int_to_ptr.vmem [resolvable:$true] %s18_s22 }
   0x3   :  { %s498_s24 = smov 64  }
   0x4   :  { %24 = dma.hbm_to_vmem [thread:$0]  %s17_s20, 4096, %s19_s22, [#allocation3], %s497_s23, %s497_s23, %s498_s24  }
   0x5   :  { %492 = dma.done.wait [#allocation3], 4096  }
   0x6   :  { %493 = vsyncadd [#allocation3], 4294963200  ;;  %v537_v0 = vld [vmem:[#allocation2 + $0xc0] sm:$0xff]  ;;  %v539_v1 = vld [vmem:[#allocation2 + $0xc8] sm:$0xff]  ;;  %vm75_vm0 = vcmask 130048   ;;  %vm104_vm1 = vcmask 64512  }
   0x7   :  { %v541_v2 = vld [vmem:[#allocation2 + $0xd0] sm:$0xff]  ;;  %v240_v3 = vadd.f32 %v539_v1, %v537_v0  ;;  %v545_v4 = vld [vmem:[#allocation2 + $0xd8] sm:$0xff]  ;;  %v547_v5 = vld [vmem:[#allocation2 + $0x80] sm:$0xff]  ;;  %s397_s11 = sshll.u32 %s694_s5, 4  ;;  %s398_s11 = int_to_ptr.hbm [resolvable:$true] %s397_s11 }
   0x8   :  { %v550_v7 = vld [vmem:[#allocation2 + $0x88] sm:$0xff]  ;;  %v552_v8 = vld [vmem:[#allocation2 + $0x90] sm:$0xff]  ;;  %v554_v9 = vld [vmem:[#allocation2 + $0xe0] sm:$0xff] }
   0x9   :  { %v241_v6 = vadd.f32 %v240_v3, %v541_v2  ;;  %v231_v10 = vadd.f32 %v550_v7, %v547_v5  ;;  %v559_v12 = vld [vmem:[#allocation2 + $0x98] sm:$0xff]  ;;  %v561_v13 = vld [vmem:[#allocation2 + $0x40] sm:$0xff]  ;;  %v563_v14 = vld [vmem:[#allocation2 + $0x48] sm:$0xff] }
   0xa   :  { %v565_v15 = vld [vmem:[#allocation2 + $0xe8] sm:$0xff]  ;;  %v568_v17 = vld [vmem:[#allocation2 + $0x50] sm:$0xff]  ;;  %v62_v18 = vadd.f32 %v563_v14, %v561_v13  ;;  %v575_v21 = vld [vmem:[#allocation2 + $0xa0] sm:$0xff] }
   0xb   :  { %v242_v11 = vadd.f32 %v241_v6, %v545_v4  ;;  %v232_v16 = vadd.f32 %v231_v10, %v552_v8  ;;  %v572_v19 = vld [vmem:[#allocation2 + $0xf0] sm:$0xff]  ;;  %v577_v22 = vld [vmem:[#allocation2 + $0x58] sm:$0xff]  ;;  %v581_v25 = vld [vmem:[#allocation2] sm:$0xff] }
   0xc   :  { %v63_v24 = vadd.f32 %v62_v18, %v568_v17  ;;  %v583_v26 = vld [vmem:[#allocation2 + $0x8] sm:$0xff]  ;;  %v585_v27 = vld [vmem:[#allocation2 + $0x10] sm:$0xff]  ;;  %v590_v30 = vld [vmem:[#allocation2 + $0x60] sm:$0xff] }
   0xd   :  { %v243_v20 = vadd.f32 %v242_v11, %v554_v9  ;;  %v233_v23 = vadd.f32 %v232_v16, %v559_v12  ;;  %v588_v29 = vld [vmem:[#allocation2 + $0xa8] sm:$0xff]  ;;  %v53_v31 = vadd.f32 %v583_v26, %v581_v25  ;;  %v594_v32 = vld [vmem:[#allocation2 + $0xf8] sm:$0xff]  ;;  %v604_v39 = vld [vmem:[#allocation2 + $0xb0] sm:$0xff] }
   0xe   :  { %v64_v34 = vadd.f32 %v63_v24, %v577_v22  ;;  %v598_v35 = vld [vmem:[#allocation2 + $0x18] sm:$0xff]  ;;  %v601_v37 = vld [vmem:[#allocation2 + $0x68] sm:$0xff]  ;;  %v608_v42 = vld [vmem:[#allocation2 + $0x20] sm:$0xff] }
   0xf   :  { %v244_v28 = vadd.f32 %v243_v20, %v565_v15  ;;  %v234_v33 = vadd.f32 %v233_v23, %v575_v21  ;;  %v54_v38 = vadd.f32 %v53_v31, %v585_v27  ;;  %v611_v44 = vld [vmem:[#allocation2 + $0x70] sm:$0xff]  ;;  %v615_v47 = vld [vmem:[#allocation2 + $0x28] sm:$0xff]  ;;  %v618_v49 = vld [vmem:[#allocation2 + $0x78] sm:$0xff] }
  0x10   :  { %v65_v41 = vadd.f32 %v64_v34, %v590_v30  ;;  %v621_v51 = vld [vmem:[#allocation2 + $0xb8] sm:$0xff]  ;;  %v624_v53 = vld [vmem:[#allocation2 + $0x30] sm:$0xff]  ;;  %v251_v10 = vld [vmem:[%s690_s1] sm:$0xff] }
  0x11   :  { %v245_v36 = vadd.f32 %v244_v28, %v572_v19  ;;  %v235_v40 = vadd.f32 %v234_v33, %v588_v29  ;;  %v55_v45 = vadd.f32 %v54_v38, %v598_v35  ;;  %v630_v58 = vld [vmem:[#allocation2 + $0x38] sm:$0xff]  ;;  %v252_v18 = vld [vmem:[%s691_s2] sm:$0xff]  ;;  %v499_v38 = vmov 0  }
  0x12   :  { %v66_v46 = vadd.f32 %v65_v41, %v601_v37  ;;  %v277_v34 = vld [vmem:[%s692_s3] sm:$0xff]  ;;  %426 = vset.pattern.permute.xlu0 %v499_v38  ;;  %427 = vset.pattern.permute.xlu1 %v499_v38 }
  0x13   :  { %v246_v43 = vadd.f32 %v245_v36, %v594_v32  ;;  %v236_v48 = vadd.f32 %v235_v40, %v604_v39  ;;  %v56_v50 = vadd.f32 %v55_v45, %v608_v42  ;;  %v278_v36 = vld [vmem:[%s692_s3 + $0x8] sm:$0xff]  ;;  %425 = vset.pattern.permute.xlu2 %v499_v38  ;;  %v279_v40 = vld [vmem:[%s693_s4] sm:$0xff]  ;;  %s500_s3 = smov [#allocation5]  }
  0x14   :  { %v67_v52 = vadd.f32 %v66_v46, %v611_v44 }
  0x15   :  { %247 = vadd.xlane.f32.xlu0 %v246_v43  ;;  %v57_v54 = vadd.f32 %v56_v50, %v615_v47  ;;  %v237_v56 = vadd.f32 %v236_v48, %v621_v51  ;;  %v280_v50 = vld [vmem:[%s693_s4 + $0x8] sm:$0xff]  ;;  %s395_s4 = sshll.u32 %s500_s3, 4  ;;  %s396_s4 = int_to_ptr.vmem [resolvable:$true] %s395_s4 }
  0x16   :  { %v68_v55 = vadd.f32 %v67_v52, %v618_v49 }
  0x17   :  { %v58_v57 = vadd.f32 %v57_v54, %v624_v53 }
  0x18   :  { %69 = vadd.xlane.f32.xlu1 %v68_v55 }
  0x19   :  { %v59_v59 = vadd.f32 %v58_v57, %v630_v58 }
  0x1d   :  { %238 = vadd.xlane.f32.xlu0 %v237_v56 }
  0x20   :  { %60 = vadd.xlane.f32.xlu1 %v59_v59 }
  0x88   :  { %v248_v60 = vpop.xlane.xlu0 %247 }
  0x89   :  { %v250_v61 = vmul.f32 0.0009765625, %v248_v60 }
  0x8b   :  { %270 = vmatpush.msra.mxu2 %v250_v61  ;;  %v70_v62 = vpop.xlane.xlu1 %69 }
  0x8c   :  { %v72_v63 = vmul.f32 0.0009765625, %v70_v62 }
  0x8e   :  { %93 = vmatpush.msra.mxu0 %v72_v63 }
  0x90   :  { %v239_v3 = vpop.xlane.xlu0 %238 }
  0x91   :  { %v249_v6 = vmul.f32 0.0009765625, %v239_v3 }
  0x93   :  { %271 = vmatpush.msra.mxu2 %v249_v6  ;;  %v61_v11 = vpop.xlane.xlu1 %60 }
  0x94   :  { %415 = vmatmul.msk.f32.vlgmr.msra.gmra.mxu2 %vm75_vm0, %v251_v10  ;;  %v71_v16 = vmul.f32 0.0009765625, %v61_v11 }
  0x96   :  { %94 = vmatpush.msra.mxu0 %v71_v16 }
  0x97   :  { %410 = vmatmul.msk.f32.vlgmr.msra.gmra.mxu0 %vm75_vm0, %v251_v10 }
 0x114   :  { %v96_v20 = vpop.f32.mrf.mxu0 }
 0x115   :  { %v97_v24 = vadd.f32 %v252_v18, %v96_v20 }
 0x117   :  { %v273_v23 = vpop.f32.mrf.mxu2  ;;  %v99_v31 = vmax.f32 %v97_v24, 0.0 }
 0x118   :  { %v274_v28 = vadd.f32 %v273_v23, %v252_v18 }
 0x119   :  { %126 = vmatpush.msra.mxu1 %v99_v31 }
 0x11a   :  { %v276_v33 = vmax.f32 %v274_v28, 0.0  ;;  %411 = vmatmul.msk.f32.vlgmr.msra.gmra.mxu1 %vm104_vm1, %v277_v34 }
 0x11c   :  { %302 = vmatpush.msra.mxu3 %v276_v33 }
 0x11d   :  { %416 = vmatmul.msk.f32.vlgmr.msra.gmra.mxu3 %vm104_vm1, %v277_v34 }
 0x122   :  { %412 = vmatmul.msk.f32.gmra.mxu1 %vm104_vm1, %v278_v36 }
 0x125   :  { %417 = vmatmul.msk.f32.gmra.mxu3 %vm104_vm1, %v278_v36 }
 0x197   :  { %v128_v41 = vpop.f32.mrf.mxu1 }
 0x198   :  { %v129_v43 = vadd.f32 %v279_v40, %v128_v41 }
 0x19a   :  { %v413_v45 = vmul.f32 -1.442695, %v129_v43 }
 0x19c   :  { %428 = vpow2.f32 %v413_v45 }
 0x19f   :  { %v131_v52 = vpop.f32.mrf.mxu1 }
 0x1a0   :  { %v304_v46 = vpop.f32.mrf.mxu3  ;;  %v132_v54 = vadd.f32 %v280_v50, %v131_v52 }
 0x1a1   :  { %v305_v48 = vadd.f32 %v304_v46, %v279_v40 }
 0x1a2   :  { %v429_v56 = vpop.eup %428  ;;  %v414_v57 = vmul.f32 -1.442695, %v132_v54 }
 0x1a3   :  { %v418_v55 = vmul.f32 -1.442695, %v305_v48  ;;  %v140_v59 = vadd.f32 1.0, %v429_v56 }
 0x1a5   :  { %430 = vpow2.f32 %v418_v55  ;;  %v153_v18 = vand.u32 2147483648, %v140_v59  ;;  %vm147_vm2 = vweird.f32 %v140_v59  ;;  %v151_v23 = vand.u32 2147483647, %v140_v59 }
 0x1a6   :  { %432 = vpow2.f32 %v414_v57 }
 0x1a7   :  { %434 = vrcp.f32 %v140_v59  ;;  %v154_v34 = vor.u32 1.1754944e-38, %v153_v18  ;;  %vm152_vm5 = vcmp.eq.f32.partialorder %v151_v23, 8.507059e+37 }
 0x1a8   :  { %v307_v60 = vpop.f32.mrf.mxu3 }
 0x1a9   :  { %v308_v61 = vadd.f32 %v307_v60, %v280_v50 }
 0x1ab   :  { %v431_v62 = vpop.eup %430  ;;  %v419_v63 = vmul.f32 -1.442695, %v308_v61 }
 0x1ac   :  { %v433_v3 = vpop.eup %432  ;;  %v316_v6 = vadd.f32 1.0, %v431_v62 }
 0x1ad   :  { %v435_v10 = vpop.eup %434  ;;  %436 = vpow2.f32 %v419_v63  ;;  %v141_v11 = vadd.f32 1.0, %v433_v3 }
 0x1ae   :  { %438 = vrcp.f32 %v316_v6  ;;  %v143_v16 = vmul.f32 %v435_v10, %v140_v59  ;;  %vm148_vm3 = vweird.f32 %v435_v10  ;;  %v327_v41 = vand.u32 2147483647, %v316_v6 }
 0x1af   :  { %440 = vrcp.f32 %v141_v11  ;;  %vm149_vm4 = vmor %vm147_vm2, %vm148_vm3  ;;  %v329_v45 = vand.u32 2147483648, %v316_v6  ;;  %vm162_vm7 = vweird.f32 %v141_v11  ;;  %v168_v52 = vand.u32 2147483648, %v141_v11 }
 0x1b0   :  { %v144_v20 = vsub.f32 1.0, %v143_v16  ;;  %v166_v56 = vand.u32 2147483647, %v141_v11  ;;  %vm323_vm9 = vweird.f32 %v316_v6  ;;  %vm328_vm11 = vcmp.eq.f32.partialorder %v327_v41, 8.507059e+37 }
 0x1b1   :  { %v330_v61 = vor.u32 1.1754944e-38, %v329_v45  ;;  %v169_v62 = vor.u32 1.1754944e-38, %v168_v52 }
 0x1b2   :  { %v145_v28 = vmul.f32 %v435_v10, %v144_v20  ;;  %vm167_vm13 = vcmp.eq.f32.partialorder %v166_v56, 8.507059e+37 }
 0x1b3   :  { %v437_v24 = vpop.eup %436 }
 0x1b4   :  { %v439_v31 = vpop.eup %438  ;;  %v317_v33 = vadd.f32 1.0, %v437_v24  ;;  %v146_v40 = vadd.f32 %v435_v10, %v145_v28 }
 0x1b5   :  { %v441_v36 = vpop.eup %440  ;;  %v319_v38 = vmul.f32 %v439_v31, %v316_v6  ;;  %vm324_vm6 = vweird.f32 %v439_v31 }
 0x1b6   :  { %442 = vrcp.f32 %v317_v33  ;;  %v150_v46 = vsel %vm149_vm4, %v435_v10, %v146_v40  ;;  %v158_v48 = vmul.f32 %v441_v36, %v141_v11  ;;  %vm163_vm8 = vweird.f32 %v441_v36  ;;  %vm325_vm10 = vmor %vm323_vm9, %vm324_vm6 }
 0x1b7   :  { %v320_v43 = vsub.f32 1.0, %v319_v38  ;;  %v155_v50 = vsel %vm152_vm5, %v154_v34, %v150_v46  ;;  %vm164_vm12 = vmor %vm162_vm7, %vm163_vm8  ;;  %v344_v23 = vand.u32 2147483648, %v317_v33  ;;  %v342_v6 = vand.u32 2147483647, %v317_v33 }
 0x1b8   :  { %174 = vperm.xlu2 %425, %v155_v50   ;;  %v159_v55 = vsub.f32 1.0, %v158_v48  ;;  %vm338_vm15 = vweird.f32 %v317_v33 }
 0x1b9   :  { %v321_v54 = vmul.f32 %v439_v31, %v320_v43  ;;  %v345_v34 = vor.u32 1.1754944e-38, %v344_v23  ;;  %vm343_vm1 = vcmp.eq.f32.partialorder %v342_v6, 8.507059e+37 }
 0x1ba   :  { %v160_v59 = vmul.f32 %v441_v36, %v159_v55 }
 0x1bb   :  { %v322_v57 = vadd.f32 %v439_v31, %v321_v54 }
 0x1bc   :  { %v443_v60 = vpop.eup %442  ;;  %v161_v10 = vadd.f32 %v441_v36, %v160_v59 }
 0x1bd   :  { %v326_v63 = vsel %vm325_vm10, %v439_v31, %v322_v57  ;;  %v334_v3 = vmul.f32 %v443_v60, %v317_v33  ;;  %vm339_vm14 = vweird.f32 %v443_v60 }
 0x1be   :  { %v331_v16 = vsel %vm328_vm11, %v330_v61, %v326_v63  ;;  %v165_v20 = vsel %vm164_vm12, %v441_v36, %v161_v10  ;;  %vm340_vm0 = vmor %vm338_vm15, %vm339_vm14 }
 0x1bf   :  { %350 = vperm.xlu0 %426, %v331_v16   ;;  %v335_v18 = vsub.f32 1.0, %v334_v3  ;;  %v170_v24 = vsel %vm167_vm13, %v169_v62, %v165_v20 }
 0x1c0   :  { %179 = vperm.xlu2 %425, %v170_v24  }
 0x1c1   :  { %v336_v11 = vmul.f32 %v443_v60, %v335_v18 }
 0x1c3   :  { %v337_v28 = vadd.f32 %v443_v60, %v336_v11 }
 0x1c5   :  { %v341_v38 = vsel %vm340_vm0, %v443_v60, %v337_v28 }
 0x1c6   :  { %v346_v31 = vsel %vm343_vm1, %v345_v34, %v341_v38 }
 0x1c7   :  { %355 = vperm.xlu1 %427, %v346_v31  }
 0x212   :  { %v175_v40 = vpop.permute.xlu2 %174 }
 0x213   :  { %v182_v41 = vmul.f32 %v175_v40, %v581_v25  ;;  %v183_v43 = vmul.f32 %v175_v40, %v583_v26  ;;  %v184_v36 = vmul.f32 %v175_v40, %v585_v27  ;;  %v185_v45 = vmul.f32 %v175_v40, %v598_v35 }
 0x214   :  { %v186_v46 = vmul.f32 %v175_v40, %v608_v42  ;;  %v187_v33 = vmul.f32 %v175_v40, %v615_v47  ;;  %v188_v48 = vmul.f32 %v175_v40, %v624_v53  ;;  %v189_v50 = vmul.f32 %v175_v40, %v630_v58 }
 0x215   :  { %198 = vst [vmem:[#allocation5] sm:$0xff] %v182_v41 }
 0x216   :  { %199 = vst [vmem:[#allocation5 + $0x8] sm:$0xff] %v183_v43 }
 0x217   :  { %200 = vst [vmem:[#allocation5 + $0x10] sm:$0xff] %v184_v36 }
 0x218   :  { %201 = vst [vmem:[#allocation5 + $0x18] sm:$0xff] %v185_v45 }
 0x219   :  { %202 = vst [vmem:[#allocation5 + $0x20] sm:$0xff] %v186_v46 }
 0x21a   :  { %203 = vst [vmem:[#allocation5 + $0x28] sm:$0xff] %v187_v33  ;;  %v180_v25 = vpop.permute.xlu2 %179 }
 0x21b   :  { %204 = vst [vmem:[#allocation5 + $0x30] sm:$0xff] %v188_v48  ;;  %v190_v26 = vmul.f32 %v180_v25, %v561_v13  ;;  %v191_v27 = vmul.f32 %v180_v25, %v563_v14  ;;  %v192_v35 = vmul.f32 %v180_v25, %v568_v17  ;;  %v193_v42 = vmul.f32 %v180_v25, %v577_v22 }
 0x21c   :  { %205 = vst [vmem:[#allocation5 + $0x38] sm:$0xff] %v189_v50  ;;  %v194_v47 = vmul.f32 %v180_v25, %v590_v30  ;;  %v195_v53 = vmul.f32 %v180_v25, %v601_v37  ;;  %v196_v58 = vmul.f32 %v180_v25, %v611_v44  ;;  %v197_v52 = vmul.f32 %v180_v25, %v618_v49 }
 0x21d   :  { %206 = vst [vmem:[#allocation5 + $0x40] sm:$0xff] %v190_v26 }
 0x21e   :  { %207 = vst [vmem:[#allocation5 + $0x48] sm:$0xff] %v191_v27 }
 0x21f   :  { %208 = vst [vmem:[#allocation5 + $0x50] sm:$0xff] %v192_v35 }
 0x220   :  { %209 = vst [vmem:[#allocation5 + $0x58] sm:$0xff] %v193_v42 }
 0x221   :  { %210 = vst [vmem:[#allocation5 + $0x60] sm:$0xff] %v194_v47 }
 0x222   :  { %211 = vst [vmem:[#allocation5 + $0x68] sm:$0xff] %v195_v53 }
 0x223   :  { %212 = vst [vmem:[#allocation5 + $0x70] sm:$0xff] %v196_v58 }
 0x224   :  { %213 = vst [vmem:[#allocation5 + $0x78] sm:$0xff] %v197_v52 }
 0x231   :  { %v351_v13 = vpop.permute.xlu0 %350 }
 0x232   :  { %v358_v14 = vmul.f32 %v351_v13, %v547_v5  ;;  %v359_v17 = vmul.f32 %v351_v13, %v550_v7  ;;  %v360_v22 = vmul.f32 %v351_v13, %v552_v8  ;;  %v361_v30 = vmul.f32 %v351_v13, %v559_v12 }
 0x233   :  { %v362_v37 = vmul.f32 %v351_v13, %v575_v21  ;;  %v363_v44 = vmul.f32 %v351_v13, %v588_v29  ;;  %v364_v49 = vmul.f32 %v351_v13, %v604_v39  ;;  %v365_v54 = vmul.f32 %v351_v13, %v621_v51 }
 0x234   :  { %375 = vst [vmem:[#allocation5 + $0x80] sm:$0xff] %v358_v14 }
 0x235   :  { %376 = vst [vmem:[#allocation5 + $0x88] sm:$0xff] %v359_v17 }
 0x236   :  { %377 = vst [vmem:[#allocation5 + $0x90] sm:$0xff] %v360_v22 }
 0x237   :  { %378 = vst [vmem:[#allocation5 + $0x98] sm:$0xff] %v361_v30 }
 0x238   :  { %379 = vst [vmem:[#allocation5 + $0xa0] sm:$0xff] %v362_v37 }
 0x239   :  { %380 = vst [vmem:[#allocation5 + $0xa8] sm:$0xff] %v363_v44  ;;  %v356_v5 = vpop.permute.xlu1 %355 }
 0x23a   :  { %381 = vst [vmem:[#allocation5 + $0xb0] sm:$0xff] %v364_v49  ;;  %v366_v7 = vmul.f32 %v356_v5, %v537_v0  ;;  %v367_v8 = vmul.f32 %v356_v5, %v539_v1  ;;  %v368_v12 = vmul.f32 %v356_v5, %v541_v2  ;;  %v369_v21 = vmul.f32 %v356_v5, %v545_v4 }
 0x23b   :  { %382 = vst [vmem:[#allocation5 + $0xb8] sm:$0xff] %v365_v54  ;;  %v370_v29 = vmul.f32 %v356_v5, %v554_v9  ;;  %v371_v39 = vmul.f32 %v356_v5, %v565_v15  ;;  %v372_v51 = vmul.f32 %v356_v5, %v572_v19  ;;  %v373_v0 = vmul.f32 %v356_v5, %v594_v32 }
 0x23c   :  { %383 = vst [vmem:[#allocation5 + $0xc0] sm:$0xff] %v366_v7 }
 0x23d   :  { %384 = vst [vmem:[#allocation5 + $0xc8] sm:$0xff] %v367_v8 }
 0x23e   :  { %385 = vst [vmem:[#allocation5 + $0xd0] sm:$0xff] %v368_v12 }
 0x23f   :  { %386 = vst [vmem:[#allocation5 + $0xd8] sm:$0xff] %v369_v21 }
 0x240   :  { %387 = vst [vmem:[#allocation5 + $0xe0] sm:$0xff] %v370_v29 }
 0x241   :  { %388 = vst [vmem:[#allocation5 + $0xe8] sm:$0xff] %v371_v39 }
 0x242   :  { %389 = vst [vmem:[#allocation5 + $0xf0] sm:$0xff] %v372_v51 }
 0x243   :  { %390 = vst [vmem:[#allocation5 + $0xf8] sm:$0xff] %v373_v0 }
 0x244   :  { %403 = dma.vmem_to_hbm [thread:$0]  %s396_s4, 4096, %s398_s11, [#allocation4], %s497_s23, %s497_s23, %s498_s24  }
 0x245   :  { %494 = dma.done.wait [#allocation4], 4096  }
 0x246   :  { %495 = vsyncadd [#allocation4], 4294963200 }
 0x247   :  { %408 = vsyncpa [#allocation3], 1 }
 0x248   :  { %409 = vsyncpa [#allocation4], 1 }

</bundles_post_ra>
